<compile_context>
chip_gen: v6e
topology: v6e:2x2x1
jax: 0.10.0
libtpu: 0.0.40
codegen_flags: <defaults>
</compile_context>

<pallas_src>
import functools
import math

import jax
import jax.numpy as jnp
from jax.experimental import pallas as pl
from jax.experimental.pallas import tpu as pltpu


def _round_up(x: int, m: int) -> int:
    return (x + m - 1) // m * m


def _embedding_kernel(ids_ref, emb_hbm, o_ref, row_buf, sems, *, tok_tile, scale):
    step = pl.program_id(0)
    base = step * tok_tile

    # Issue one row-gather DMA per token of this tile (all in flight at once).
    for t in range(tok_tile):
        tok = ids_ref[base + t]
        pltpu.make_async_copy(
            emb_hbm.at[pl.ds(tok, 1), :],
            row_buf.at[pl.ds(t, 1), :],
            sems.at[t],
        ).start()

    # Wait for every row DMA of this tile (same-shaped descriptors).
    for t in range(tok_tile):
        pltpu.make_async_copy(
            emb_hbm.at[pl.ds(0, 1), :],
            row_buf.at[pl.ds(t, 1), :],
            sems.at[t],
        ).wait()

    # Scale in f32 and write the full lane-dense output tile in one store.
    x = row_buf[...].astype(jnp.float32) * jnp.float32(scale)
    o_ref[...] = x.astype(o_ref.dtype)


def input_embedding(ids, emb_table, *, tok_tile: int = 32):
    """ids: int array (...,) of token indices. emb_table: (vocab, d_model)."""
    vocab, d = emb_table.shape
    scale = math.sqrt(d)

    ids_flat = ids.reshape(-1).astype(jnp.int32)
    n = ids_flat.shape[0]

    # Tile selection: multiple of 8 sublanes, capped by a VMEM budget and by
    # the (rounded-up) token count.  Keeps DMA unroll and VMEM use bounded.
    itemsize = emb_table.dtype.itemsize
    budget = 8 * 1024 * 1024                       # scratch + output buffers
    per_row = d * (4 + 2 * itemsize)               # f32 temp + 2x out buffers
    max_rows = max(8, (budget // max(per_row, 1)) // 8 * 8)
    tok_tile = max(8, min(tok_tile, max_rows, _round_up(n, 8)))

    n_pad = _round_up(n, tok_tile)
    if n_pad != n:
        ids_flat = jnp.pad(ids_flat, (0, n_pad - n))   # pad with token 0 (valid)

    grid = (n_pad // tok_tile,)
    out = pl.pallas_call(
        functools.partial(_embedding_kernel, tok_tile=tok_tile, scale=scale),
        out_shape=jax.ShapeDtypeStruct((n_pad, d), emb_table.dtype),
        grid_spec=pltpu.PrefetchScalarGridSpec(
            num_scalar_prefetch=1,                       # ids -> SMEM
            grid=grid,
            in_specs=[pl.BlockSpec(memory_space=pl.ANY)],  # table stays in HBM
            out_specs=pl.BlockSpec((tok_tile, d), lambda i, ids: (i, 0)),
            scratch_shapes=[
                pltpu.VMEM((tok_tile, d), emb_table.dtype),  # gathered rows
                pltpu.SemaphoreType.DMA((tok_tile,)),        # per-row DMA sems
            ],
        ),
        compiler_params=pltpu.CompilerParams(
            dimension_semantics=("parallel",),
            vmem_limit_bytes=32 * 1024 * 1024,
        ),
    )(ids_flat, emb_table)

    return out[:n].reshape(*ids.shape, d)


class InputEmbedding:
    """Mirror of the PyTorch module: embedding lookup scaled by sqrt(d_model)."""

    def __init__(self, d_model: int, vocab_size: int, key):
        self.d_model = d_model
        self.vocab_size = vocab_size
        # nn.Embedding default init: N(0, 1).
        self.embedding = jax.random.normal(key, (vocab_size, d_model), jnp.float32)

    def __call__(self, x):
        return input_embedding(x, self.embedding)


if __name__ == "__main__":
    key = jax.random.PRNGKey(0)
    k_emb, k_ids = jax.random.split(key)

    # Small but lane-dense shapes: d_model a multiple of 128 keeps the output
    # stores unmasked (the biggest single perf lever for this mem-bound kernel).
    B, S = 2, 8
    d_model, vocab_size = 128, 256

    module = InputEmbedding(d_model, vocab_size, k_emb)
    ids = jax.random.randint(k_ids, (B, S), 0, vocab_size, dtype=jnp.int32)

    out = module(ids)
    out = jax.block_until_ready(out)

    ref = module.embedding[ids] * math.sqrt(d_model)
    assert out.shape == (B, S, d_model)
    assert jnp.allclose(out, ref, atol=1e-6, rtol=1e-6), "mismatch vs reference"
    print("KERNEL_OK")
</pallas_src>

<mosaic_0001>
module attributes {stable_mosaic.version = 11 : i64} {
  func.func @_embedding_kernel(%arg0: i32, %arg1: memref<16xi32, #tpu.memory_space<smem>>, %arg2: memref<256x128xf32, #tpu.memory_space<any>>, %arg3: memref<16x128xf32, #tpu.memory_space<vmem>>, %arg4: memref<16x128xf32, #tpu.memory_space<vmem>>, %arg5: memref<16x!tpu.dma_semaphore, #tpu.memory_space<semaphore_mem>>) attributes {dimension_semantics = [#tpu.dimension_semantics<parallel>], iteration_bounds = array<i64: 1>, scalar_prefetch = 1 : i64, scratch_operands = 2 : i64, tpu.core_type = #tpu.core_type<tc>, window_params = [{}, {transform_indices = @transform_1, window_bounds = array<i64: 16, 128>}]} {
    %c16_i32 = arith.constant 16 : i32
    %0 = arith.muli %arg0, %c16_i32 : i32
    %c0_i32 = arith.constant 0 : i32
    %1 = arith.addi %0, %c0_i32 : i32
    %2 = arith.index_cast %1 : i32 to index
    %3 = memref.load %arg1[%2] : memref<16xi32, #tpu.memory_space<smem>>
    %c0_i32_0 = arith.constant 0 : i32
    %c0_i32_1 = arith.constant 0 : i32
    %4 = tpu.memref_slice %arg2[%3, %c0_i32_1] : memref<256x128xf32, #tpu.memory_space<any>> -> memref<1x128xf32, #tpu.memory_space<any>>
    %c0_i32_2 = arith.constant 0 : i32
    %c0_i32_3 = arith.constant 0 : i32
    %5 = tpu.memref_slice %arg4[%c0_i32_2, %c0_i32_3] : memref<16x128xf32, #tpu.memory_space<vmem>> -> memref<1x128xf32, #tpu.memory_space<vmem>>
    %6 = tpu.memref_slice %arg5[%c0_i32_0] : memref<16x!tpu.dma_semaphore, #tpu.memory_space<semaphore_mem>> -> memref<1x!tpu.dma_semaphore, #tpu.memory_space<semaphore_mem>>
    %7 = tpu.memref_squeeze %6 : memref<1x!tpu.dma_semaphore, #tpu.memory_space<semaphore_mem>> -> memref<!tpu.dma_semaphore, #tpu.memory_space<semaphore_mem>>
    tpu.enqueue_dma source(%4 : memref<1x128xf32, #tpu.memory_space<any>>) target(%5 : memref<1x128xf32, #tpu.memory_space<vmem>>) target_semaphore(%7 : memref<!tpu.dma_semaphore, #tpu.memory_space<semaphore_mem>>)
    %c1_i32 = arith.constant 1 : i32
    %8 = arith.addi %0, %c1_i32 : i32
    %9 = arith.index_cast %8 : i32 to index
    %10 = memref.load %arg1[%9] : memref<16xi32, #tpu.memory_space<smem>>
    %c1_i32_4 = arith.constant 1 : i32
    %c0_i32_5 = arith.constant 0 : i32
    %11 = tpu.memref_slice %arg2[%10, %c0_i32_5] : memref<256x128xf32, #tpu.memory_space<any>> -> memref<1x128xf32, #tpu.memory_space<any>>
    %c1_i32_6 = arith.constant 1 : i32
    %c0_i32_7 = arith.constant 0 : i32
    %12 = tpu.memref_slice %arg4[%c1_i32_6, %c0_i32_7] : memref<16x128xf32, #tpu.memory_space<vmem>> -> memref<1x128xf32, #tpu.memory_space<vmem>>
    %13 = tpu.memref_slice %arg5[%c1_i32_4] : memref<16x!tpu.dma_semaphore, #tpu.memory_space<semaphore_mem>> -> memref<1x!tpu.dma_semaphore, #tpu.memory_space<semaphore_mem>>
    %14 = tpu.memref_squeeze %13 : memref<1x!tpu.dma_semaphore, #tpu.memory_space<semaphore_mem>> -> memref<!tpu.dma_semaphore, #tpu.memory_space<semaphore_mem>>
    tpu.enqueue_dma source(%11 : memref<1x128xf32, #tpu.memory_space<any>>) target(%12 : memref<1x128xf32, #tpu.memory_space<vmem>>) target_semaphore(%14 : memref<!tpu.dma_semaphore, #tpu.memory_space<semaphore_mem>>)
    %c2_i32 = arith.constant 2 : i32
    %15 = arith.addi %0, %c2_i32 : i32
    %16 = arith.index_cast %15 : i32 to index
    %17 = memref.load %arg1[%16] : memref<16xi32, #tpu.memory_space<smem>>
    %c2_i32_8 = arith.constant 2 : i32
    %c0_i32_9 = arith.constant 0 : i32
    %18 = tpu.memref_slice %arg2[%17, %c0_i32_9] : memref<256x128xf32, #tpu.memory_space<any>> -> memref<1x128xf32, #tpu.memory_space<any>>
    %c2_i32_10 = arith.constant 2 : i32
    %c0_i32_11 = arith.constant 0 : i32
    %19 = tpu.memref_slice %arg4[%c2_i32_10, %c0_i32_11] : memref<16x128xf32, #tpu.memory_space<vmem>> -> memref<1x128xf32, #tpu.memory_space<vmem>>
    %20 = tpu.memref_slice %arg5[%c2_i32_8] : memref<16x!tpu.dma_semaphore, #tpu.memory_space<semaphore_mem>> -> memref<1x!tpu.dma_semaphore, #tpu.memory_space<semaphore_mem>>
    %21 = tpu.memref_squeeze %20 : memref<1x!tpu.dma_semaphore, #tpu.memory_space<semaphore_mem>> -> memref<!tpu.dma_semaphore, #tpu.memory_space<semaphore_mem>>
    tpu.enqueue_dma source(%18 : memref<1x128xf32, #tpu.memory_space<any>>) target(%19 : memref<1x128xf32, #tpu.memory_space<vmem>>) target_semaphore(%21 : memref<!tpu.dma_semaphore, #tpu.memory_space<semaphore_mem>>)
    %c3_i32 = arith.constant 3 : i32
    %22 = arith.addi %0, %c3_i32 : i32
    %23 = arith.index_cast %22 : i32 to index
    %24 = memref.load %arg1[%23] : memref<16xi32, #tpu.memory_space<smem>>
    %c3_i32_12 = arith.constant 3 : i32
    %c0_i32_13 = arith.constant 0 : i32
    %25 = tpu.memref_slice %arg2[%24, %c0_i32_13] : memref<256x128xf32, #tpu.memory_space<any>> -> memref<1x128xf32, #tpu.memory_space<any>>
    %c3_i32_14 = arith.constant 3 : i32
    %c0_i32_15 = arith.constant 0 : i32
    %26 = tpu.memref_slice %arg4[%c3_i32_14, %c0_i32_15] : memref<16x128xf32, #tpu.memory_space<vmem>> -> memref<1x128xf32, #tpu.memory_space<vmem>>
    %27 = tpu.memref_slice %arg5[%c3_i32_12] : memref<16x!tpu.dma_semaphore, #tpu.memory_space<semaphore_mem>> -> memref<1x!tpu.dma_semaphore, #tpu.memory_space<semaphore_mem>>
    %28 = tpu.memref_squeeze %27 : memref<1x!tpu.dma_semaphore, #tpu.memory_space<semaphore_mem>> -> memref<!tpu.dma_semaphore, #tpu.memory_space<semaphore_mem>>
    tpu.enqueue_dma source(%25 : memref<1x128xf32, #tpu.memory_space<any>>) target(%26 : memref<1x128xf32, #tpu.memory_space<vmem>>) target_semaphore(%28 : memref<!tpu.dma_semaphore, #tpu.memory_space<semaphore_mem>>)
    %c4_i32 = arith.constant 4 : i32
    %29 = arith.addi %0, %c4_i32 : i32
    %30 = arith.index_cast %29 : i32 to index
    %31 = memref.load %arg1[%30] : memref<16xi32, #tpu.memory_space<smem>>
    %c4_i32_16 = arith.constant 4 : i32
    %c0_i32_17 = arith.constant 0 : i32
    %32 = tpu.memref_slice %arg2[%31, %c0_i32_17] : memref<256x128xf32, #tpu.memory_space<any>> -> memref<1x128xf32, #tpu.memory_space<any>>
    %c4_i32_18 = arith.constant 4 : i32
    %c0_i32_19 = arith.constant 0 : i32
    %33 = tpu.memref_slice %arg4[%c4_i32_18, %c0_i32_19] : memref<16x128xf32, #tpu.memory_space<vmem>> -> memref<1x128xf32, #tpu.memory_space<vmem>>
    %34 = tpu.memref_slice %arg5[%c4_i32_16] : memref<16x!tpu.dma_semaphore, #tpu.memory_space<semaphore_mem>> -> memref<1x!tpu.dma_semaphore, #tpu.memory_space<semaphore_mem>>
    %35 = tpu.memref_squeeze %34 : memref<1x!tpu.dma_semaphore, #tpu.memory_space<semaphore_mem>> -> memref<!tpu.dma_semaphore, #tpu.memory_space<semaphore_mem>>
    tpu.enqueue_dma source(%32 : memref<1x128xf32, #tpu.memory_space<any>>) target(%33 : memref<1x128xf32, #tpu.memory_space<vmem>>) target_semaphore(%35 : memref<!tpu.dma_semaphore, #tpu.memory_space<semaphore_mem>>)
    %c5_i32 = arith.constant 5 : i32
    %36 = arith.addi %0, %c5_i32 : i32
    %37 = arith.index_cast %36 : i32 to index
    %38 = memref.load %arg1[%37] : memref<16xi32, #tpu.memory_space<smem>>
    %c5_i32_20 = arith.constant 5 : i32
    %c0_i32_21 = arith.constant 0 : i32
    %39 = tpu.memref_slice %arg2[%38, %c0_i32_21] : memref<256x128xf32, #tpu.memory_space<any>> -> memref<1x128xf32, #tpu.memory_space<any>>
    %c5_i32_22 = arith.constant 5 : i32
    %c0_i32_23 = arith.constant 0 : i32
    %40 = tpu.memref_slice %arg4[%c5_i32_22, %c0_i32_23] : memref<16x128xf32, #tpu.memory_space<vmem>> -> memref<1x128xf32, #tpu.memory_space<vmem>>
    %41 = tpu.memref_slice %arg5[%c5_i32_20] : memref<16x!tpu.dma_semaphore, #tpu.memory_space<semaphore_mem>> -> memref<1x!tpu.dma_semaphore, #tpu.memory_space<semaphore_mem>>
    %42 = tpu.memref_squeeze %41 : memref<1x!tpu.dma_semaphore, #tpu.memory_space<semaphore_mem>> -> memref<!tpu.dma_semaphore, #tpu.memory_space<semaphore_mem>>
    tpu.enqueue_dma source(%39 : memref<1x128xf32, #tpu.memory_space<any>>) target(%40 : memref<1x128xf32, #tpu.memory_space<vmem>>) target_semaphore(%42 : memref<!tpu.dma_semaphore, #tpu.memory_space<semaphore_mem>>)
    %c6_i32 = arith.constant 6 : i32
    %43 = arith.addi %0, %c6_i32 : i32
    %44 = arith.index_cast %43 : i32 to index
    %45 = memref.load %arg1[%44] : memref<16xi32, #tpu.memory_space<smem>>
    %c6_i32_24 = arith.constant 6 : i32
    %c0_i32_25 = arith.constant 0 : i32
    %46 = tpu.memref_slice %arg2[%45, %c0_i32_25] : memref<256x128xf32, #tpu.memory_space<any>> -> memref<1x128xf32, #tpu.memory_space<any>>
    %c6_i32_26 = arith.constant 6 : i32
    %c0_i32_27 = arith.constant 0 : i32
    %47 = tpu.memref_slice %arg4[%c6_i32_26, %c0_i32_27] : memref<16x128xf32, #tpu.memory_space<vmem>> -> memref<1x128xf32, #tpu.memory_space<vmem>>
    %48 = tpu.memref_slice %arg5[%c6_i32_24] : memref<16x!tpu.dma_semaphore, #tpu.memory_space<semaphore_mem>> -> memref<1x!tpu.dma_semaphore, #tpu.memory_space<semaphore_mem>>
    %49 = tpu.memref_squeeze %48 : memref<1x!tpu.dma_semaphore, #tpu.memory_space<semaphore_mem>> -> memref<!tpu.dma_semaphore, #tpu.memory_space<semaphore_mem>>
    tpu.enqueue_dma source(%46 : memref<1x128xf32, #tpu.memory_space<any>>) target(%47 : memref<1x128xf32, #tpu.memory_space<vmem>>) target_semaphore(%49 : memref<!tpu.dma_semaphore, #tpu.memory_space<semaphore_mem>>)
    %c7_i32 = arith.constant 7 : i32
    %50 = arith.addi %0, %c7_i32 : i32
    %51 = arith.index_cast %50 : i32 to index
    %52 = memref.load %arg1[%51] : memref<16xi32, #tpu.memory_space<smem>>
    %c7_i32_28 = arith.constant 7 : i32
    %c0_i32_29 = arith.constant 0 : i32
    %53 = tpu.memref_slice %arg2[%52, %c0_i32_29] : memref<256x128xf32, #tpu.memory_space<any>> -> memref<1x128xf32, #tpu.memory_space<any>>
    %c7_i32_30 = arith.constant 7 : i32
    %c0_i32_31 = arith.constant 0 : i32
    %54 = tpu.memref_slice %arg4[%c7_i32_30, %c0_i32_31] : memref<16x128xf32, #tpu.memory_space<vmem>> -> memref<1x128xf32, #tpu.memory_space<vmem>>
    %55 = tpu.memref_slice %arg5[%c7_i32_28] : memref<16x!tpu.dma_semaphore, #tpu.memory_space<semaphore_mem>> -> memref<1x!tpu.dma_semaphore, #tpu.memory_space<semaphore_mem>>
    %56 = tpu.memref_squeeze %55 : memref<1x!tpu.dma_semaphore, #tpu.memory_space<semaphore_mem>> -> memref<!tpu.dma_semaphore, #tpu.memory_space<semaphore_mem>>
    tpu.enqueue_dma source(%53 : memref<1x128xf32, #tpu.memory_space<any>>) target(%54 : memref<1x128xf32, #tpu.memory_space<vmem>>) target_semaphore(%56 : memref<!tpu.dma_semaphore, #tpu.memory_space<semaphore_mem>>)
    %c8_i32 = arith.constant 8 : i32
    %57 = arith.addi %0, %c8_i32 : i32
    %58 = arith.index_cast %57 : i32 to index
    %59 = memref.load %arg1[%58] : memref<16xi32, #tpu.memory_space<smem>>
    %c8_i32_32 = arith.constant 8 : i32
    %c0_i32_33 = arith.constant 0 : i32
    %60 = tpu.memref_slice %arg2[%59, %c0_i32_33] : memref<256x128xf32, #tpu.memory_space<any>> -> memref<1x128xf32, #tpu.memory_space<any>>
    %c8_i32_34 = arith.constant 8 : i32
    %c0_i32_35 = arith.constant 0 : i32
    %61 = tpu.memref_slice %arg4[%c8_i32_34, %c0_i32_35] : memref<16x128xf32, #tpu.memory_space<vmem>> -> memref<1x128xf32, #tpu.memory_space<vmem>>
    %62 = tpu.memref_slice %arg5[%c8_i32_32] : memref<16x!tpu.dma_semaphore, #tpu.memory_space<semaphore_mem>> -> memref<1x!tpu.dma_semaphore, #tpu.memory_space<semaphore_mem>>
    %63 = tpu.memref_squeeze %62 : memref<1x!tpu.dma_semaphore, #tpu.memory_space<semaphore_mem>> -> memref<!tpu.dma_semaphore, #tpu.memory_space<semaphore_mem>>
    tpu.enqueue_dma source(%60 : memref<1x128xf32, #tpu.memory_space<any>>) target(%61 : memref<1x128xf32, #tpu.memory_space<vmem>>) target_semaphore(%63 : memref<!tpu.dma_semaphore, #tpu.memory_space<semaphore_mem>>)
    %c9_i32 = arith.constant 9 : i32
    %64 = arith.addi %0, %c9_i32 : i32
    %65 = arith.index_cast %64 : i32 to index
    %66 = memref.load %arg1[%65] : memref<16xi32, #tpu.memory_space<smem>>
    %c9_i32_36 = arith.constant 9 : i32
    %c0_i32_37 = arith.constant 0 : i32
    %67 = tpu.memref_slice %arg2[%66, %c0_i32_37] : memref<256x128xf32, #tpu.memory_space<any>> -> memref<1x128xf32, #tpu.memory_space<any>>
    %c9_i32_38 = arith.constant 9 : i32
    %c0_i32_39 = arith.constant 0 : i32
    %68 = tpu.memref_slice %arg4[%c9_i32_38, %c0_i32_39] : memref<16x128xf32, #tpu.memory_space<vmem>> -> memref<1x128xf32, #tpu.memory_space<vmem>>
    %69 = tpu.memref_slice %arg5[%c9_i32_36] : memref<16x!tpu.dma_semaphore, #tpu.memory_space<semaphore_mem>> -> memref<1x!tpu.dma_semaphore, #tpu.memory_space<semaphore_mem>>
    %70 = tpu.memref_squeeze %69 : memref<1x!tpu.dma_semaphore, #tpu.memory_space<semaphore_mem>> -> memref<!tpu.dma_semaphore, #tpu.memory_space<semaphore_mem>>
    tpu.enqueue_dma source(%67 : memref<1x128xf32, #tpu.memory_space<any>>) target(%68 : memref<1x128xf32, #tpu.memory_space<vmem>>) target_semaphore(%70 : memref<!tpu.dma_semaphore, #tpu.memory_space<semaphore_mem>>)
    %c10_i32 = arith.constant 10 : i32
    %71 = arith.addi %0, %c10_i32 : i32
    %72 = arith.index_cast %71 : i32 to index
    %73 = memref.load %arg1[%72] : memref<16xi32, #tpu.memory_space<smem>>
    %c10_i32_40 = arith.constant 10 : i32
    %c0_i32_41 = arith.constant 0 : i32
    %74 = tpu.memref_slice %arg2[%73, %c0_i32_41] : memref<256x128xf32, #tpu.memory_space<any>> -> memref<1x128xf32, #tpu.memory_space<any>>
    %c10_i32_42 = arith.constant 10 : i32
    %c0_i32_43 = arith.constant 0 : i32
    %75 = tpu.memref_slice %arg4[%c10_i32_42, %c0_i32_43] : memref<16x128xf32, #tpu.memory_space<vmem>> -> memref<1x128xf32, #tpu.memory_space<vmem>>
    %76 = tpu.memref_slice %arg5[%c10_i32_40] : memref<16x!tpu.dma_semaphore, #tpu.memory_space<semaphore_mem>> -> memref<1x!tpu.dma_semaphore, #tpu.memory_space<semaphore_mem>>
    %77 = tpu.memref_squeeze %76 : memref<1x!tpu.dma_semaphore, #tpu.memory_space<semaphore_mem>> -> memref<!tpu.dma_semaphore, #tpu.memory_space<semaphore_mem>>
    tpu.enqueue_dma source(%74 : memref<1x128xf32, #tpu.memory_space<any>>) target(%75 : memref<1x128xf32, #tpu.memory_space<vmem>>) target_semaphore(%77 : memref<!tpu.dma_semaphore, #tpu.memory_space<semaphore_mem>>)
    %c11_i32 = arith.constant 11 : i32
    %78 = arith.addi %0, %c11_i32 : i32
    %79 = arith.index_cast %78 : i32 to index
    %80 = memref.load %arg1[%79] : memref<16xi32, #tpu.memory_space<smem>>
    %c11_i32_44 = arith.constant 11 : i32
    %c0_i32_45 = arith.constant 0 : i32
    %81 = tpu.memref_slice %arg2[%80, %c0_i32_45] : memref<256x128xf32, #tpu.memory_space<any>> -> memref<1x128xf32, #tpu.memory_space<any>>
    %c11_i32_46 = arith.constant 11 : i32
    %c0_i32_47 = arith.constant 0 : i32
    %82 = tpu.memref_slice %arg4[%c11_i32_46, %c0_i32_47] : memref<16x128xf32, #tpu.memory_space<vmem>> -> memref<1x128xf32, #tpu.memory_space<vmem>>
    %83 = tpu.memref_slice %arg5[%c11_i32_44] : memref<16x!tpu.dma_semaphore, #tpu.memory_space<semaphore_mem>> -> memref<1x!tpu.dma_semaphore, #tpu.memory_space<semaphore_mem>>
    %84 = tpu.memref_squeeze %83 : memref<1x!tpu.dma_semaphore, #tpu.memory_space<semaphore_mem>> -> memref<!tpu.dma_semaphore, #tpu.memory_space<semaphore_mem>>
    tpu.enqueue_dma source(%81 : memref<1x128xf32, #tpu.memory_space<any>>) target(%82 : memref<1x128xf32, #tpu.memory_space<vmem>>) target_semaphore(%84 : memref<!tpu.dma_semaphore, #tpu.memory_space<semaphore_mem>>)
    %c12_i32 = arith.constant 12 : i32
    %85 = arith.addi %0, %c12_i32 : i32
    %86 = arith.index_cast %85 : i32 to index
    %87 = memref.load %arg1[%86] : memref<16xi32, #tpu.memory_space<smem>>
    %c12_i32_48 = arith.constant 12 : i32
    %c0_i32_49 = arith.constant 0 : i32
    %88 = tpu.memref_slice %arg2[%87, %c0_i32_49] : memref<256x128xf32, #tpu.memory_space<any>> -> memref<1x128xf32, #tpu.memory_space<any>>
    %c12_i32_50 = arith.constant 12 : i32
    %c0_i32_51 = arith.constant 0 : i32
    %89 = tpu.memref_slice %arg4[%c12_i32_50, %c0_i32_51] : memref<16x128xf32, #tpu.memory_space<vmem>> -> memref<1x128xf32, #tpu.memory_space<vmem>>
    %90 = tpu.memref_slice %arg5[%c12_i32_48] : memref<16x!tpu.dma_semaphore, #tpu.memory_space<semaphore_mem>> -> memref<1x!tpu.dma_semaphore, #tpu.memory_space<semaphore_mem>>
    %91 = tpu.memref_squeeze %90 : memref<1x!tpu.dma_semaphore, #tpu.memory_space<semaphore_mem>> -> memref<!tpu.dma_semaphore, #tpu.memory_space<semaphore_mem>>
    tpu.enqueue_dma source(%88 : memref<1x128xf32, #tpu.memory_space<any>>) target(%89 : memref<1x128xf32, #tpu.memory_space<vmem>>) target_semaphore(%91 : memref<!tpu.dma_semaphore, #tpu.memory_space<semaphore_mem>>)
    %c13_i32 = arith.constant 13 : i32
    %92 = arith.addi %0, %c13_i32 : i32
    %93 = arith.index_cast %92 : i32 to index
    %94 = memref.load %arg1[%93] : memref<16xi32, #tpu.memory_space<smem>>
    %c13_i32_52 = arith.constant 13 : i32
    %c0_i32_53 = arith.constant 0 : i32
    %95 = tpu.memref_slice %arg2[%94, %c0_i32_53] : memref<256x128xf32, #tpu.memory_space<any>> -> memref<1x128xf32, #tpu.memory_space<any>>
    %c13_i32_54 = arith.constant 13 : i32
    %c0_i32_55 = arith.constant 0 : i32
    %96 = tpu.memref_slice %arg4[%c13_i32_54, %c0_i32_55] : memref<16x128xf32, #tpu.memory_space<vmem>> -> memref<1x128xf32, #tpu.memory_space<vmem>>
    %97 = tpu.memref_slice %arg5[%c13_i32_52] : memref<16x!tpu.dma_semaphore, #tpu.memory_space<semaphore_mem>> -> memref<1x!tpu.dma_semaphore, #tpu.memory_space<semaphore_mem>>
    %98 = tpu.memref_squeeze %97 : memref<1x!tpu.dma_semaphore, #tpu.memory_space<semaphore_mem>> -> memref<!tpu.dma_semaphore, #tpu.memory_space<semaphore_mem>>
    tpu.enqueue_dma source(%95 : memref<1x128xf32, #tpu.memory_space<any>>) target(%96 : memref<1x128xf32, #tpu.memory_space<vmem>>) target_semaphore(%98 : memref<!tpu.dma_semaphore, #tpu.memory_space<semaphore_mem>>)
    %c14_i32 = arith.constant 14 : i32
    %99 = arith.addi %0, %c14_i32 : i32
    %100 = arith.index_cast %99 : i32 to index
    %101 = memref.load %arg1[%100] : memref<16xi32, #tpu.memory_space<smem>>
    %c14_i32_56 = arith.constant 14 : i32
    %c0_i32_57 = arith.constant 0 : i32
    %102 = tpu.memref_slice %arg2[%101, %c0_i32_57] : memref<256x128xf32, #tpu.memory_space<any>> -> memref<1x128xf32, #tpu.memory_space<any>>
    %c14_i32_58 = arith.constant 14 : i32
    %c0_i32_59 = arith.constant 0 : i32
    %103 = tpu.memref_slice %arg4[%c14_i32_58, %c0_i32_59] : memref<16x128xf32, #tpu.memory_space<vmem>> -> memref<1x128xf32, #tpu.memory_space<vmem>>
    %104 = tpu.memref_slice %arg5[%c14_i32_56] : memref<16x!tpu.dma_semaphore, #tpu.memory_space<semaphore_mem>> -> memref<1x!tpu.dma_semaphore, #tpu.memory_space<semaphore_mem>>
    %105 = tpu.memref_squeeze %104 : memref<1x!tpu.dma_semaphore, #tpu.memory_space<semaphore_mem>> -> memref<!tpu.dma_semaphore, #tpu.memory_space<semaphore_mem>>
    tpu.enqueue_dma source(%102 : memref<1x128xf32, #tpu.memory_space<any>>) target(%103 : memref<1x128xf32, #tpu.memory_space<vmem>>) target_semaphore(%105 : memref<!tpu.dma_semaphore, #tpu.memory_space<semaphore_mem>>)
    %c15_i32 = arith.constant 15 : i32
    %106 = arith.addi %0, %c15_i32 : i32
    %107 = arith.index_cast %106 : i32 to index
    %108 = memref.load %arg1[%107] : memref<16xi32, #tpu.memory_space<smem>>
    %c15_i32_60 = arith.constant 15 : i32
    %c0_i32_61 = arith.constant 0 : i32
    %109 = tpu.memref_slice %arg2[%108, %c0_i32_61] : memref<256x128xf32, #tpu.memory_space<any>> -> memref<1x128xf32, #tpu.memory_space<any>>
    %c15_i32_62 = arith.constant 15 : i32
    %c0_i32_63 = arith.constant 0 : i32
    %110 = tpu.memref_slice %arg4[%c15_i32_62, %c0_i32_63] : memref<16x128xf32, #tpu.memory_space<vmem>> -> memref<1x128xf32, #tpu.memory_space<vmem>>
    %111 = tpu.memref_slice %arg5[%c15_i32_60] : memref<16x!tpu.dma_semaphore, #tpu.memory_space<semaphore_mem>> -> memref<1x!tpu.dma_semaphore, #tpu.memory_space<semaphore_mem>>
    %112 = tpu.memref_squeeze %111 : memref<1x!tpu.dma_semaphore, #tpu.memory_space<semaphore_mem>> -> memref<!tpu.dma_semaphore, #tpu.memory_space<semaphore_mem>>
    tpu.enqueue_dma source(%109 : memref<1x128xf32, #tpu.memory_space<any>>) target(%110 : memref<1x128xf32, #tpu.memory_space<vmem>>) target_semaphore(%112 : memref<!tpu.dma_semaphore, #tpu.memory_space<semaphore_mem>>)
    %c0_i32_64 = arith.constant 0 : i32
    %c0_i32_65 = arith.constant 0 : i32
    %c0_i32_66 = arith.constant 0 : i32
    %113 = tpu.memref_slice %arg2[%c0_i32_65, %c0_i32_66] : memref<256x128xf32, #tpu.memory_space<any>> -> memref<1x128xf32, #tpu.memory_space<any>>
    %c0_i32_67 = arith.constant 0 : i32
    %c0_i32_68 = arith.constant 0 : i32
    %114 = tpu.memref_slice %arg4[%c0_i32_67, %c0_i32_68] : memref<16x128xf32, #tpu.memory_space<vmem>> -> memref<1x128xf32, #tpu.memory_space<vmem>>
    %115 = tpu.memref_slice %arg5[%c0_i32_64] : memref<16x!tpu.dma_semaphore, #tpu.memory_space<semaphore_mem>> -> memref<1x!tpu.dma_semaphore, #tpu.memory_space<semaphore_mem>>
    %116 = tpu.memref_squeeze %115 : memref<1x!tpu.dma_semaphore, #tpu.memory_space<semaphore_mem>> -> memref<!tpu.dma_semaphore, #tpu.memory_space<semaphore_mem>>
    tpu.wait_dma2 semaphore(%116 : memref<!tpu.dma_semaphore, #tpu.memory_space<semaphore_mem>>) src(%113 : memref<1x128xf32, #tpu.memory_space<any>>) dst(%114 : memref<1x128xf32, #tpu.memory_space<vmem>>)
    %c1_i32_69 = arith.constant 1 : i32
    %c0_i32_70 = arith.constant 0 : i32
    %c0_i32_71 = arith.constant 0 : i32
    %117 = tpu.memref_slice %arg2[%c0_i32_70, %c0_i32_71] : memref<256x128xf32, #tpu.memory_space<any>> -> memref<1x128xf32, #tpu.memory_space<any>>
    %c1_i32_72 = arith.constant 1 : i32
    %c0_i32_73 = arith.constant 0 : i32
    %118 = tpu.memref_slice %arg4[%c1_i32_72, %c0_i32_73] : memref<16x128xf32, #tpu.memory_space<vmem>> -> memref<1x128xf32, #tpu.memory_space<vmem>>
    %119 = tpu.memref_slice %arg5[%c1_i32_69] : memref<16x!tpu.dma_semaphore, #tpu.memory_space<semaphore_mem>> -> memref<1x!tpu.dma_semaphore, #tpu.memory_space<semaphore_mem>>
    %120 = tpu.memref_squeeze %119 : memref<1x!tpu.dma_semaphore, #tpu.memory_space<semaphore_mem>> -> memref<!tpu.dma_semaphore, #tpu.memory_space<semaphore_mem>>
    tpu.wait_dma2 semaphore(%120 : memref<!tpu.dma_semaphore, #tpu.memory_space<semaphore_mem>>) src(%117 : memref<1x128xf32, #tpu.memory_space<any>>) dst(%118 : memref<1x128xf32, #tpu.memory_space<vmem>>)
    %c2_i32_74 = arith.constant 2 : i32
    %c0_i32_75 = arith.constant 0 : i32
    %c0_i32_76 = arith.constant 0 : i32
    %121 = tpu.memref_slice %arg2[%c0_i32_75, %c0_i32_76] : memref<256x128xf32, #tpu.memory_space<any>> -> memref<1x128xf32, #tpu.memory_space<any>>
    %c2_i32_77 = arith.constant 2 : i32
    %c0_i32_78 = arith.constant 0 : i32
    %122 = tpu.memref_slice %arg4[%c2_i32_77, %c0_i32_78] : memref<16x128xf32, #tpu.memory_space<vmem>> -> memref<1x128xf32, #tpu.memory_space<vmem>>
    %123 = tpu.memref_slice %arg5[%c2_i32_74] : memref<16x!tpu.dma_semaphore, #tpu.memory_space<semaphore_mem>> -> memref<1x!tpu.dma_semaphore, #tpu.memory_space<semaphore_mem>>
    %124 = tpu.memref_squeeze %123 : memref<1x!tpu.dma_semaphore, #tpu.memory_space<semaphore_mem>> -> memref<!tpu.dma_semaphore, #tpu.memory_space<semaphore_mem>>
    tpu.wait_dma2 semaphore(%124 : memref<!tpu.dma_semaphore, #tpu.memory_space<semaphore_mem>>) src(%121 : memref<1x128xf32, #tpu.memory_space<any>>) dst(%122 : memref<1x128xf32, #tpu.memory_space<vmem>>)
    %c3_i32_79 = arith.constant 3 : i32
    %c0_i32_80 = arith.constant 0 : i32
    %c0_i32_81 = arith.constant 0 : i32
    %125 = tpu.memref_slice %arg2[%c0_i32_80, %c0_i32_81] : memref<256x128xf32, #tpu.memory_space<any>> -> memref<1x128xf32, #tpu.memory_space<any>>
    %c3_i32_82 = arith.constant 3 : i32
    %c0_i32_83 = arith.constant 0 : i32
    %126 = tpu.memref_slice %arg4[%c3_i32_82, %c0_i32_83] : memref<16x128xf32, #tpu.memory_space<vmem>> -> memref<1x128xf32, #tpu.memory_space<vmem>>
    %127 = tpu.memref_slice %arg5[%c3_i32_79] : memref<16x!tpu.dma_semaphore, #tpu.memory_space<semaphore_mem>> -> memref<1x!tpu.dma_semaphore, #tpu.memory_space<semaphore_mem>>
    %128 = tpu.memref_squeeze %127 : memref<1x!tpu.dma_semaphore, #tpu.memory_space<semaphore_mem>> -> memref<!tpu.dma_semaphore, #tpu.memory_space<semaphore_mem>>
    tpu.wait_dma2 semaphore(%128 : memref<!tpu.dma_semaphore, #tpu.memory_space<semaphore_mem>>) src(%125 : memref<1x128xf32, #tpu.memory_space<any>>) dst(%126 : memref<1x128xf32, #tpu.memory_space<vmem>>)
    %c4_i32_84 = arith.constant 4 : i32
    %c0_i32_85 = arith.constant 0 : i32
    %c0_i32_86 = arith.constant 0 : i32
    %129 = tpu.memref_slice %arg2[%c0_i32_85, %c0_i32_86] : memref<256x128xf32, #tpu.memory_space<any>> -> memref<1x128xf32, #tpu.memory_space<any>>
    %c4_i32_87 = arith.constant 4 : i32
    %c0_i32_88 = arith.constant 0 : i32
    %130 = tpu.memref_slice %arg4[%c4_i32_87, %c0_i32_88] : memref<16x128xf32, #tpu.memory_space<vmem>> -> memref<1x128xf32, #tpu.memory_space<vmem>>
    %131 = tpu.memref_slice %arg5[%c4_i32_84] : memref<16x!tpu.dma_semaphore, #tpu.memory_space<semaphore_mem>> -> memref<1x!tpu.dma_semaphore, #tpu.memory_space<semaphore_mem>>
    %132 = tpu.memref_squeeze %131 : memref<1x!tpu.dma_semaphore, #tpu.memory_space<semaphore_mem>> -> memref<!tpu.dma_semaphore, #tpu.memory_space<semaphore_mem>>
    tpu.wait_dma2 semaphore(%132 : memref<!tpu.dma_semaphore, #tpu.memory_space<semaphore_mem>>) src(%129 : memref<1x128xf32, #tpu.memory_space<any>>) dst(%130 : memref<1x128xf32, #tpu.memory_space<vmem>>)
    %c5_i32_89 = arith.constant 5 : i32
    %c0_i32_90 = arith.constant 0 : i32
    %c0_i32_91 = arith.constant 0 : i32
    %133 = tpu.memref_slice %arg2[%c0_i32_90, %c0_i32_91] : memref<256x128xf32, #tpu.memory_space<any>> -> memref<1x128xf32, #tpu.memory_space<any>>
    %c5_i32_92 = arith.constant 5 : i32
    %c0_i32_93 = arith.constant 0 : i32
    %134 = tpu.memref_slice %arg4[%c5_i32_92, %c0_i32_93] : memref<16x128xf32, #tpu.memory_space<vmem>> -> memref<1x128xf32, #tpu.memory_space<vmem>>
    %135 = tpu.memref_slice %arg5[%c5_i32_89] : memref<16x!tpu.dma_semaphore, #tpu.memory_space<semaphore_mem>> -> memref<1x!tpu.dma_semaphore, #tpu.memory_space<semaphore_mem>>
    %136 = tpu.memref_squeeze %135 : memref<1x!tpu.dma_semaphore, #tpu.memory_space<semaphore_mem>> -> memref<!tpu.dma_semaphore, #tpu.memory_space<semaphore_mem>>
    tpu.wait_dma2 semaphore(%136 : memref<!tpu.dma_semaphore, #tpu.memory_space<semaphore_mem>>) src(%133 : memref<1x128xf32, #tpu.memory_space<any>>) dst(%134 : memref<1x128xf32, #tpu.memory_space<vmem>>)
    %c6_i32_94 = arith.constant 6 : i32
    %c0_i32_95 = arith.constant 0 : i32
    %c0_i32_96 = arith.constant 0 : i32
    %137 = tpu.memref_slice %arg2[%c0_i32_95, %c0_i32_96] : memref<256x128xf32, #tpu.memory_space<any>> -> memref<1x128xf32, #tpu.memory_space<any>>
    %c6_i32_97 = arith.constant 6 : i32
    %c0_i32_98 = arith.constant 0 : i32
    %138 = tpu.memref_slice %arg4[%c6_i32_97, %c0_i32_98] : memref<16x128xf32, #tpu.memory_space<vmem>> -> memref<1x128xf32, #tpu.memory_space<vmem>>
    %139 = tpu.memref_slice %arg5[%c6_i32_94] : memref<16x!tpu.dma_semaphore, #tpu.memory_space<semaphore_mem>> -> memref<1x!tpu.dma_semaphore, #tpu.memory_space<semaphore_mem>>
    %140 = tpu.memref_squeeze %139 : memref<1x!tpu.dma_semaphore, #tpu.memory_space<semaphore_mem>> -> memref<!tpu.dma_semaphore, #tpu.memory_space<semaphore_mem>>
    tpu.wait_dma2 semaphore(%140 : memref<!tpu.dma_semaphore, #tpu.memory_space<semaphore_mem>>) src(%137 : memref<1x128xf32, #tpu.memory_space<any>>) dst(%138 : memref<1x128xf32, #tpu.memory_space<vmem>>)
    %c7_i32_99 = arith.constant 7 : i32
    %c0_i32_100 = arith.constant 0 : i32
    %c0_i32_101 = arith.constant 0 : i32
    %141 = tpu.memref_slice %arg2[%c0_i32_100, %c0_i32_101] : memref<256x128xf32, #tpu.memory_space<any>> -> memref<1x128xf32, #tpu.memory_space<any>>
    %c7_i32_102 = arith.constant 7 : i32
    %c0_i32_103 = arith.constant 0 : i32
    %142 = tpu.memref_slice %arg4[%c7_i32_102, %c0_i32_103] : memref<16x128xf32, #tpu.memory_space<vmem>> -> memref<1x128xf32, #tpu.memory_space<vmem>>
    %143 = tpu.memref_slice %arg5[%c7_i32_99] : memref<16x!tpu.dma_semaphore, #tpu.memory_space<semaphore_mem>> -> memref<1x!tpu.dma_semaphore, #tpu.memory_space<semaphore_mem>>
    %144 = tpu.memref_squeeze %143 : memref<1x!tpu.dma_semaphore, #tpu.memory_space<semaphore_mem>> -> memref<!tpu.dma_semaphore, #tpu.memory_space<semaphore_mem>>
    tpu.wait_dma2 semaphore(%144 : memref<!tpu.dma_semaphore, #tpu.memory_space<semaphore_mem>>) src(%141 : memref<1x128xf32, #tpu.memory_space<any>>) dst(%142 : memref<1x128xf32, #tpu.memory_space<vmem>>)
    %c8_i32_104 = arith.constant 8 : i32
    %c0_i32_105 = arith.constant 0 : i32
    %c0_i32_106 = arith.constant 0 : i32
    %145 = tpu.memref_slice %arg2[%c0_i32_105, %c0_i32_106] : memref<256x128xf32, #tpu.memory_space<any>> -> memref<1x128xf32, #tpu.memory_space<any>>
    %c8_i32_107 = arith.constant 8 : i32
    %c0_i32_108 = arith.constant 0 : i32
    %146 = tpu.memref_slice %arg4[%c8_i32_107, %c0_i32_108] : memref<16x128xf32, #tpu.memory_space<vmem>> -> memref<1x128xf32, #tpu.memory_space<vmem>>
    %147 = tpu.memref_slice %arg5[%c8_i32_104] : memref<16x!tpu.dma_semaphore, #tpu.memory_space<semaphore_mem>> -> memref<1x!tpu.dma_semaphore, #tpu.memory_space<semaphore_mem>>
    %148 = tpu.memref_squeeze %147 : memref<1x!tpu.dma_semaphore, #tpu.memory_space<semaphore_mem>> -> memref<!tpu.dma_semaphore, #tpu.memory_space<semaphore_mem>>
    tpu.wait_dma2 semaphore(%148 : memref<!tpu.dma_semaphore, #tpu.memory_space<semaphore_mem>>) src(%145 : memref<1x128xf32, #tpu.memory_space<any>>) dst(%146 : memref<1x128xf32, #tpu.memory_space<vmem>>)
    %c9_i32_109 = arith.constant 9 : i32
    %c0_i32_110 = arith.constant 0 : i32
    %c0_i32_111 = arith.constant 0 : i32
    %149 = tpu.memref_slice %arg2[%c0_i32_110, %c0_i32_111] : memref<256x128xf32, #tpu.memory_space<any>> -> memref<1x128xf32, #tpu.memory_space<any>>
    %c9_i32_112 = arith.constant 9 : i32
    %c0_i32_113 = arith.constant 0 : i32
    %150 = tpu.memref_slice %arg4[%c9_i32_112, %c0_i32_113] : memref<16x128xf32, #tpu.memory_space<vmem>> -> memref<1x128xf32, #tpu.memory_space<vmem>>
    %151 = tpu.memref_slice %arg5[%c9_i32_109] : memref<16x!tpu.dma_semaphore, #tpu.memory_space<semaphore_mem>> -> memref<1x!tpu.dma_semaphore, #tpu.memory_space<semaphore_mem>>
    %152 = tpu.memref_squeeze %151 : memref<1x!tpu.dma_semaphore, #tpu.memory_space<semaphore_mem>> -> memref<!tpu.dma_semaphore, #tpu.memory_space<semaphore_mem>>
    tpu.wait_dma2 semaphore(%152 : memref<!tpu.dma_semaphore, #tpu.memory_space<semaphore_mem>>) src(%149 : memref<1x128xf32, #tpu.memory_space<any>>) dst(%150 : memref<1x128xf32, #tpu.memory_space<vmem>>)
    %c10_i32_114 = arith.constant 10 : i32
    %c0_i32_115 = arith.constant 0 : i32
    %c0_i32_116 = arith.constant 0 : i32
    %153 = tpu.memref_slice %arg2[%c0_i32_115, %c0_i32_116] : memref<256x128xf32, #tpu.memory_space<any>> -> memref<1x128xf32, #tpu.memory_space<any>>
    %c10_i32_117 = arith.constant 10 : i32
    %c0_i32_118 = arith.constant 0 : i32
    %154 = tpu.memref_slice %arg4[%c10_i32_117, %c0_i32_118] : memref<16x128xf32, #tpu.memory_space<vmem>> -> memref<1x128xf32, #tpu.memory_space<vmem>>
    %155 = tpu.memref_slice %arg5[%c10_i32_114] : memref<16x!tpu.dma_semaphore, #tpu.memory_space<semaphore_mem>> -> memref<1x!tpu.dma_semaphore, #tpu.memory_space<semaphore_mem>>
    %156 = tpu.memref_squeeze %155 : memref<1x!tpu.dma_semaphore, #tpu.memory_space<semaphore_mem>> -> memref<!tpu.dma_semaphore, #tpu.memory_space<semaphore_mem>>
    tpu.wait_dma2 semaphore(%156 : memref<!tpu.dma_semaphore, #tpu.memory_space<semaphore_mem>>) src(%153 : memref<1x128xf32, #tpu.memory_space<any>>) dst(%154 : memref<1x128xf32, #tpu.memory_space<vmem>>)
    %c11_i32_119 = arith.constant 11 : i32
    %c0_i32_120 = arith.constant 0 : i32
    %c0_i32_121 = arith.constant 0 : i32
    %157 = tpu.memref_slice %arg2[%c0_i32_120, %c0_i32_121] : memref<256x128xf32, #tpu.memory_space<any>> -> memref<1x128xf32, #tpu.memory_space<any>>
    %c11_i32_122 = arith.constant 11 : i32
    %c0_i32_123 = arith.constant 0 : i32
    %158 = tpu.memref_slice %arg4[%c11_i32_122, %c0_i32_123] : memref<16x128xf32, #tpu.memory_space<vmem>> -> memref<1x128xf32, #tpu.memory_space<vmem>>
    %159 = tpu.memref_slice %arg5[%c11_i32_119] : memref<16x!tpu.dma_semaphore, #tpu.memory_space<semaphore_mem>> -> memref<1x!tpu.dma_semaphore, #tpu.memory_space<semaphore_mem>>
    %160 = tpu.memref_squeeze %159 : memref<1x!tpu.dma_semaphore, #tpu.memory_space<semaphore_mem>> -> memref<!tpu.dma_semaphore, #tpu.memory_space<semaphore_mem>>
    tpu.wait_dma2 semaphore(%160 : memref<!tpu.dma_semaphore, #tpu.memory_space<semaphore_mem>>) src(%157 : memref<1x128xf32, #tpu.memory_space<any>>) dst(%158 : memref<1x128xf32, #tpu.memory_space<vmem>>)
    %c12_i32_124 = arith.constant 12 : i32
    %c0_i32_125 = arith.constant 0 : i32
    %c0_i32_126 = arith.constant 0 : i32
    %161 = tpu.memref_slice %arg2[%c0_i32_125, %c0_i32_126] : memref<256x128xf32, #tpu.memory_space<any>> -> memref<1x128xf32, #tpu.memory_space<any>>
    %c12_i32_127 = arith.constant 12 : i32
    %c0_i32_128 = arith.constant 0 : i32
    %162 = tpu.memref_slice %arg4[%c12_i32_127, %c0_i32_128] : memref<16x128xf32, #tpu.memory_space<vmem>> -> memref<1x128xf32, #tpu.memory_space<vmem>>
    %163 = tpu.memref_slice %arg5[%c12_i32_124] : memref<16x!tpu.dma_semaphore, #tpu.memory_space<semaphore_mem>> -> memref<1x!tpu.dma_semaphore, #tpu.memory_space<semaphore_mem>>
    %164 = tpu.memref_squeeze %163 : memref<1x!tpu.dma_semaphore, #tpu.memory_space<semaphore_mem>> -> memref<!tpu.dma_semaphore, #tpu.memory_space<semaphore_mem>>
    tpu.wait_dma2 semaphore(%164 : memref<!tpu.dma_semaphore, #tpu.memory_space<semaphore_mem>>) src(%161 : memref<1x128xf32, #tpu.memory_space<any>>) dst(%162 : memref<1x128xf32, #tpu.memory_space<vmem>>)
    %c13_i32_129 = arith.constant 13 : i32
    %c0_i32_130 = arith.constant 0 : i32
    %c0_i32_131 = arith.constant 0 : i32
    %165 = tpu.memref_slice %arg2[%c0_i32_130, %c0_i32_131] : memref<256x128xf32, #tpu.memory_space<any>> -> memref<1x128xf32, #tpu.memory_space<any>>
    %c13_i32_132 = arith.constant 13 : i32
    %c0_i32_133 = arith.constant 0 : i32
    %166 = tpu.memref_slice %arg4[%c13_i32_132, %c0_i32_133] : memref<16x128xf32, #tpu.memory_space<vmem>> -> memref<1x128xf32, #tpu.memory_space<vmem>>
    %167 = tpu.memref_slice %arg5[%c13_i32_129] : memref<16x!tpu.dma_semaphore, #tpu.memory_space<semaphore_mem>> -> memref<1x!tpu.dma_semaphore, #tpu.memory_space<semaphore_mem>>
    %168 = tpu.memref_squeeze %167 : memref<1x!tpu.dma_semaphore, #tpu.memory_space<semaphore_mem>> -> memref<!tpu.dma_semaphore, #tpu.memory_space<semaphore_mem>>
    tpu.wait_dma2 semaphore(%168 : memref<!tpu.dma_semaphore, #tpu.memory_space<semaphore_mem>>) src(%165 : memref<1x128xf32, #tpu.memory_space<any>>) dst(%166 : memref<1x128xf32, #tpu.memory_space<vmem>>)
    %c14_i32_134 = arith.constant 14 : i32
    %c0_i32_135 = arith.constant 0 : i32
    %c0_i32_136 = arith.constant 0 : i32
    %169 = tpu.memref_slice %arg2[%c0_i32_135, %c0_i32_136] : memref<256x128xf32, #tpu.memory_space<any>> -> memref<1x128xf32, #tpu.memory_space<any>>
    %c14_i32_137 = arith.constant 14 : i32
    %c0_i32_138 = arith.constant 0 : i32
    %170 = tpu.memref_slice %arg4[%c14_i32_137, %c0_i32_138] : memref<16x128xf32, #tpu.memory_space<vmem>> -> memref<1x128xf32, #tpu.memory_space<vmem>>
    %171 = tpu.memref_slice %arg5[%c14_i32_134] : memref<16x!tpu.dma_semaphore, #tpu.memory_space<semaphore_mem>> -> memref<1x!tpu.dma_semaphore, #tpu.memory_space<semaphore_mem>>
    %172 = tpu.memref_squeeze %171 : memref<1x!tpu.dma_semaphore, #tpu.memory_space<semaphore_mem>> -> memref<!tpu.dma_semaphore, #tpu.memory_space<semaphore_mem>>
    tpu.wait_dma2 semaphore(%172 : memref<!tpu.dma_semaphore, #tpu.memory_space<semaphore_mem>>) src(%169 : memref<1x128xf32, #tpu.memory_space<any>>) dst(%170 : memref<1x128xf32, #tpu.memory_space<vmem>>)
    %c15_i32_139 = arith.constant 15 : i32
    %c0_i32_140 = arith.constant 0 : i32
    %c0_i32_141 = arith.constant 0 : i32
    %173 = tpu.memref_slice %arg2[%c0_i32_140, %c0_i32_141] : memref<256x128xf32, #tpu.memory_space<any>> -> memref<1x128xf32, #tpu.memory_space<any>>
    %c15_i32_142 = arith.constant 15 : i32
    %c0_i32_143 = arith.constant 0 : i32
    %174 = tpu.memref_slice %arg4[%c15_i32_142, %c0_i32_143] : memref<16x128xf32, #tpu.memory_space<vmem>> -> memref<1x128xf32, #tpu.memory_space<vmem>>
    %175 = tpu.memref_slice %arg5[%c15_i32_139] : memref<16x!tpu.dma_semaphore, #tpu.memory_space<semaphore_mem>> -> memref<1x!tpu.dma_semaphore, #tpu.memory_space<semaphore_mem>>
    %176 = tpu.memref_squeeze %175 : memref<1x!tpu.dma_semaphore, #tpu.memory_space<semaphore_mem>> -> memref<!tpu.dma_semaphore, #tpu.memory_space<semaphore_mem>>
    tpu.wait_dma2 semaphore(%176 : memref<!tpu.dma_semaphore, #tpu.memory_space<semaphore_mem>>) src(%173 : memref<1x128xf32, #tpu.memory_space<any>>) dst(%174 : memref<1x128xf32, #tpu.memory_space<vmem>>)
    %c0 = arith.constant 0 : index
    %c0_144 = arith.constant 0 : index
    %177 = vector.load %arg4[%c0, %c0_144] : memref<16x128xf32, #tpu.memory_space<vmem>>, vector<16x128xf32>
    %cst = arith.constant 11.3137083 : f32
    %178 = vector.broadcast %cst : f32 to vector<16x128xf32>
    %179 = arith.mulf %177, %178 : vector<16x128xf32>
    %c0_145 = arith.constant 0 : index
    %c0_146 = arith.constant 0 : index
    %180 = vector.load %arg3[%c0_145, %c0_146] : memref<16x128xf32, #tpu.memory_space<vmem>>, vector<16x128xf32>
    tpu.vector_store %arg3[%c0_145, %c0_146], %179 {strides = array<i32>} : memref<16x128xf32, #tpu.memory_space<vmem>>, vector<16x128xf32>,
    return
  }
  func.func @transform_1(%arg0: i32, %arg1: memref<16xi32, #tpu.memory_space<smem>>) -> (i32, i32) {
    %c0_i32 = arith.constant 0 : i32
    %c0_i32_0 = arith.constant 0 : i32
    return %arg0, %c0_i32 : i32, i32
  }
}

</mosaic_0001>

<bundles_post_ra>
// kernel: tpu_custom_call.1
= control target key start
LH: loop header
LB: loop body
LE: loop exit
PB: predicated region body
PF: predicated region fallthrough
CT: control target
= control target key end

     0   :  { %s963_s9 = smov [#allocation5]   ;;  %s1243_s0 = inlined_call_operand.hbm [shape: s32[16], index: 0, kind: input, shape index: {}]   ;;  %s1244_s1 = inlined_call_operand.hbm [shape: f32[256,128], index: 1, kind: input, shape index: {}]   ;;  %s1245_s2 = inlined_call_operand.hbm [shape: f32[16,128], index: 2, kind: output, shape index: {}]  }
   0x1   :  { %8 = dma.hbm_to_smem %s1243_s0, 16, %s963_s9, [#allocation4] }
   0x2   :  { %927 = dma.done.wait [#allocation4], 16 }
   0x3   :  { %928 = vsyncadd [#allocation4], 4294967280 }
   0x4   :  { %10 = sfence }
   0x5   :  { %11 = vsyncpa [#allocation7], 0  ;;  %s13_s12 = sld [smem:[#allocation5]]  ;;  %s964_s13 = smov [#allocation2]  }
   0x6   :  { %s23_s14 = sshll.u32 %s964_s13, 4  ;;  %s1001_s15 = sld [smem:[#allocation5 + $0x1]]  ;;  %s1003_s14 = int_to_ptr.vmem [resolvable:$true] %s23_s14 }
   0x7   :  { %s965_s16 = smov [#allocation2 + $0x1]   ;;  %s1005_s18 = sld [smem:[#allocation5 + $0x2]] }
   0x8   :  { %s40_s17 = sshll.u32 %s965_s16, 4  ;;  %s966_s19 = smov [#allocation2 + $0x2]   ;;  %s1007_s17 = int_to_ptr.vmem [resolvable:$true] %s40_s17 }
   0x9   :  { %s57_s0 = sshll.u32 %s966_s19, 4  ;;  %s1009_s20 = sld [smem:[#allocation5 + $0x3]]  ;;  %s1011_s0 = int_to_ptr.vmem [resolvable:$true] %s57_s0 }
   0xa   :  { %s1020_s29 = scalar_lea.hbm %s1244_s1, 4096 }
   0xb   :  { %s480_s21 = sshll.u32 %s13_s12, 4 }
   0xc   :  { %s15_s24 = scalar_lea.hbm %s1244_s1, %s480_s21  ;;  %s482_s25 = sshll.u32 %s1001_s15, 4 }
   0xd   :  { %s555_s26 = scalar_lea.hbm %s15_s24, 16  ;;  %p558_p1 = scmp.lt.s32.totalorder %s15_s24, %s1244_s1 }
   0xe   :  { %p556_p0 = scmp.ne.s32.totalorder %s15_s24, %s555_s26  ;;  %p559_p2 = scmp.lt.s32.totalorder %s1020_s29, %s555_s26 }
  0x10   :  { %p560_p3 = por %p559_p2, %p558_p1 }
  0x12   :  { %p561_p4 = pnand %p560_p3, %p556_p0 }
  0x14   :  { %564 = shalt.err (!%p561_p4)  }
  0x15   :  { %s565_s4 = scalar_lea.vmem %s1003_s14, 16  ;;  %s1029_s5 = scalar_lea.vmem %s1003_s14, 256 }
  0x16   :  { %p566_p5 = scmp.ne.s32.totalorder %s1003_s14, %s565_s4  ;;  %p570_p6 = scmp.lt.s32.totalorder %s1003_s14, %s1003_s14 }
  0x17   :  { %p571_p7 = scmp.lt.s32.totalorder %s1029_s5, %s565_s4 }
  0x19   :  { %p572_p8 = por %p571_p7, %p570_p6 }
  0x1b   :  { %p573_p9 = pnand %p572_p8, %p566_p5 }
  0x1d   :  { %576 = shalt.err (!%p573_p9)  }
  0x1e   :  { %26 = dma.hbm_to_vmem [thread:$0]  %s15_s24, 16, %s1003_s14, [#allocation3] }
  0x1f   :  { %s30_s8 = scalar_lea.hbm %s1244_s1, %s482_s25  ;;  %s484_s9 = sshll.u32 %s1005_s18, 4 }
  0x20   :  { %s577_s10 = scalar_lea.hbm %s30_s8, 16  ;;  %p580_p11 = scmp.lt.s32.totalorder %s30_s8, %s1244_s1 }
  0x21   :  { %p578_p10 = scmp.ne.s32.totalorder %s30_s8, %s577_s10  ;;  %p581_p12 = scmp.lt.s32.totalorder %s1020_s29, %s577_s10 }
  0x23   :  { %p582_p13 = por %p581_p12, %p580_p11 }
  0x25   :  { %p583_p0 = pnand %p582_p13, %p578_p10 }
  0x27   :  { %586 = shalt.err (!%p583_p0)  }
  0x28   :  { %s587_s13 = scalar_lea.vmem %s1007_s17, 16  ;;  %p592_p2 = scmp.lt.s32.totalorder %s1007_s17, %s1003_s14 }
  0x29   :  { %p588_p1 = scmp.ne.s32.totalorder %s1007_s17, %s587_s13  ;;  %p593_p3 = scmp.lt.s32.totalorder %s1029_s5, %s587_s13 }
  0x2b   :  { %p594_p4 = por %p593_p3, %p592_p2 }
  0x2d   :  { %p595_p5 = pnand %p594_p4, %p588_p1 }
  0x2f   :  { %598 = shalt.err (!%p595_p5)  }
  0x30   :  { %43 = dma.hbm_to_vmem [thread:$0]  %s30_s8, 16, %s1007_s17, [#allocation3 + $0x1] }
  0x31   :  { %s47_s18 = scalar_lea.hbm %s1244_s1, %s484_s9  ;;  %s486_s19 = sshll.u32 %s1009_s20, 4 }
  0x32   :  { %s599_s21 = scalar_lea.hbm %s47_s18, 16  ;;  %p602_p7 = scmp.lt.s32.totalorder %s47_s18, %s1244_s1 }
  0x33   :  { %p600_p6 = scmp.ne.s32.totalorder %s47_s18, %s599_s21  ;;  %p603_p8 = scmp.lt.s32.totalorder %s1020_s29, %s599_s21 }
  0x35   :  { %p604_p9 = por %p603_p8, %p602_p7 }
  0x37   :  { %p605_p10 = pnand %p604_p9, %p600_p6 }
  0x39   :  { %608 = shalt.err (!%p605_p10)  }
  0x3a   :  { %s609_s17 = scalar_lea.vmem %s1011_s0, 16  ;;  %p614_p12 = scmp.lt.s32.totalorder %s1011_s0, %s1003_s14 }
  0x3b   :  { %p610_p11 = scmp.ne.s32.totalorder %s1011_s0, %s609_s17  ;;  %p615_p13 = scmp.lt.s32.totalorder %s1029_s5, %s609_s17 }
  0x3d   :  { %p616_p0 = por %p615_p13, %p614_p12 }
  0x3f   :  { %p617_p1 = pnand %p616_p0, %p610_p11 }
  0x41   :  { %620 = shalt.err (!%p617_p1)  }
  0x42   :  { %60 = dma.hbm_to_vmem [thread:$0]  %s47_s18, 16, %s1011_s0, [#allocation3 + $0x2] }
  0x43   :  { %s64_s25 = scalar_lea.hbm %s1244_s1, %s486_s19  ;;  %s967_s26 = smov [#allocation2 + $0x3]  }
  0x44   :  { %s74_s27 = sshll.u32 %s967_s26, 4  ;;  %s487_s28 = sld [smem:[#allocation5 + $0x4]]  ;;  %s75_s27 = int_to_ptr.vmem [resolvable:$true] %s74_s27 }
  0x45   :  { %s621_s30 = scalar_lea.hbm %s64_s25, 16  ;;  %p624_p3 = scmp.lt.s32.totalorder %s64_s25, %s1244_s1 }
  0x46   :  { %p622_p2 = scmp.ne.s32.totalorder %s64_s25, %s621_s30  ;;  %p625_p4 = scmp.lt.s32.totalorder %s1020_s29, %s621_s30 }
  0x48   :  { %p626_p5 = por %p625_p4, %p624_p3 }
  0x4a   :  { %p627_p6 = pnand %p626_p5, %p622_p2 }
  0x4c   :  { %630 = shalt.err (!%p627_p6)  }
  0x4d   :  { %s631_s6 = scalar_lea.vmem %s75_s27, 16  ;;  %p636_p8 = scmp.lt.s32.totalorder %s75_s27, %s1003_s14 }
  0x4e   :  { %p632_p7 = scmp.ne.s32.totalorder %s75_s27, %s631_s6  ;;  %p637_p9 = scmp.lt.s32.totalorder %s1029_s5, %s631_s6 }
  0x50   :  { %p638_p10 = por %p637_p9, %p636_p8 }
  0x52   :  { %p639_p11 = pnand %p638_p10, %p632_p7 }
  0x54   :  { %642 = shalt.err (!%p639_p11)  }
  0x55   :  { %77 = dma.hbm_to_vmem [thread:$0]  %s64_s25, 16, %s75_s27, [#allocation3 + $0x3] }
  0x56   :  { %s968_s0 = smov [#allocation2 + $0x4]   ;;  %s489_s8 = sld [smem:[#allocation5 + $0x5]] }
  0x57   :  { %s91_s7 = sshll.u32 %s968_s0, 4  ;;  %s969_s9 = smov [#allocation2 + $0x5]   ;;  %s92_s7 = int_to_ptr.vmem [resolvable:$true] %s91_s7 }
  0x58   :  { %s108_s10 = sshll.u32 %s969_s9, 4  ;;  %s1072_s11 = sld [smem:[#allocation5 + $0x6]]  ;;  %s1074_s10 = int_to_ptr.vmem [resolvable:$true] %s108_s10 }
  0x59   :  { %s488_s12 = sshll.u32 %s487_s28, 4 }
  0x5a   :  { %s81_s16 = scalar_lea.hbm %s1244_s1, %s488_s12 }
  0x5b   :  { %s643_s18 = scalar_lea.hbm %s81_s16, 16  ;;  %p646_p13 = scmp.lt.s32.totalorder %s81_s16, %s1244_s1 }
  0x5c   :  { %p644_p12 = scmp.ne.s32.totalorder %s81_s16, %s643_s18  ;;  %p647_p0 = scmp.lt.s32.totalorder %s1020_s29, %s643_s18 }
  0x5e   :  { %p648_p1 = por %p647_p0, %p646_p13 }
  0x60   :  { %p649_p2 = pnand %p648_p1, %p644_p12 }
  0x62   :  { %652 = shalt.err (!%p649_p2)  }
  0x63   :  { %s653_s22 = scalar_lea.vmem %s92_s7, 16  ;;  %p658_p4 = scmp.lt.s32.totalorder %s92_s7, %s1003_s14 }
  0x64   :  { %p654_p3 = scmp.ne.s32.totalorder %s92_s7, %s653_s22  ;;  %p659_p5 = scmp.lt.s32.totalorder %s1029_s5, %s653_s22 }
  0x66   :  { %p660_p6 = por %p659_p5, %p658_p4 }
  0x68   :  { %p661_p7 = pnand %p660_p6, %p654_p3 }
  0x6a   :  { %664 = shalt.err (!%p661_p7)  }
  0x6b   :  { %94 = dma.hbm_to_vmem [thread:$0]  %s81_s16, 16, %s92_s7, [#allocation3 + $0x4] }
  0x6c   :  { %s490_s23 = sshll.u32 %s489_s8, 4  ;;  %s970_s17 = smov [#allocation2 + $0x6]  }
  0x6d   :  { %s125_s20 = sshll.u32 %s970_s17, 4  ;;  %s98_s26 = scalar_lea.hbm %s1244_s1, %s490_s23  ;;  %s1088_s20 = int_to_ptr.vmem [resolvable:$true] %s125_s20 }
  0x6e   :  { %s665_s27 = scalar_lea.hbm %s98_s26, 16  ;;  %p668_p9 = scmp.lt.s32.totalorder %s98_s26, %s1244_s1 }
  0x6f   :  { %p666_p8 = scmp.ne.s32.totalorder %s98_s26, %s665_s27  ;;  %p669_p10 = scmp.lt.s32.totalorder %s1020_s29, %s665_s27 }
  0x71   :  { %p670_p11 = por %p669_p10, %p668_p9 }
  0x73   :  { %p671_p12 = pnand %p670_p11, %p666_p8 }
  0x75   :  { %674 = shalt.err (!%p671_p12)  }
  0x76   :  { %s675_s3 = scalar_lea.vmem %s1074_s10, 16  ;;  %p680_p0 = scmp.lt.s32.totalorder %s1074_s10, %s1003_s14 }
  0x77   :  { %p676_p13 = scmp.ne.s32.totalorder %s1074_s10, %s675_s3  ;;  %p681_p1 = scmp.lt.s32.totalorder %s1029_s5, %s675_s3 }
  0x79   :  { %p682_p2 = por %p681_p1, %p680_p0 }
  0x7b   :  { %p683_p3 = pnand %p682_p2, %p676_p13 }
  0x7d   :  { %686 = shalt.err (!%p683_p3)  }
  0x7e   :  { %111 = dma.hbm_to_vmem [thread:$0]  %s98_s26, 16, %s1074_s10, [#allocation3 + $0x5] }
  0x7f   :  { %s492_s4 = sshll.u32 %s1072_s11, 4  ;;  %s493_s6 = sld [smem:[#allocation5 + $0x7]] }
  0x80   :  { %s115_s8 = scalar_lea.hbm %s1244_s1, %s492_s4 }
  0x81   :  { %s687_s9 = scalar_lea.hbm %s115_s8, 16  ;;  %p690_p5 = scmp.lt.s32.totalorder %s115_s8, %s1244_s1 }
  0x82   :  { %p688_p4 = scmp.ne.s32.totalorder %s115_s8, %s687_s9  ;;  %p691_p6 = scmp.lt.s32.totalorder %s1020_s29, %s687_s9 }
  0x84   :  { %p692_p7 = por %p691_p6, %p690_p5 }
  0x86   :  { %p693_p8 = pnand %p692_p7, %p688_p4 }
  0x88   :  { %696 = shalt.err (!%p693_p8)  }
  0x89   :  { %s697_s10 = scalar_lea.vmem %s1088_s20, 16  ;;  %p702_p10 = scmp.lt.s32.totalorder %s1088_s20, %s1003_s14 }
  0x8a   :  { %p698_p9 = scmp.ne.s32.totalorder %s1088_s20, %s697_s10  ;;  %p703_p11 = scmp.lt.s32.totalorder %s1029_s5, %s697_s10 }
  0x8c   :  { %p704_p12 = por %p703_p11, %p702_p10 }
  0x8e   :  { %p705_p13 = pnand %p704_p12, %p698_p9 }
  0x90   :  { %708 = shalt.err (!%p705_p13)  }
  0x91   :  { %128 = dma.hbm_to_vmem [thread:$0]  %s115_s8, 16, %s1088_s20, [#allocation3 + $0x6] }
  0x92   :  { %s971_s11 = smov [#allocation2 + $0x7]   ;;  %s495_s16 = sld [smem:[#allocation5 + $0x8]] }
  0x93   :  { %s142_s15 = sshll.u32 %s971_s11, 4  ;;  %s972_s18 = smov [#allocation2 + $0x8]   ;;  %s143_s15 = int_to_ptr.vmem [resolvable:$true] %s142_s15 }
  0x94   :  { %s159_s19 = sshll.u32 %s972_s18, 4  ;;  %s1114_s21 = sld [smem:[#allocation5 + $0x9]]  ;;  %s1116_s19 = int_to_ptr.vmem [resolvable:$true] %s159_s19 }
  0x95   :  { %s494_s22 = sshll.u32 %s493_s6, 4 }
  0x96   :  { %s132_s24 = scalar_lea.hbm %s1244_s1, %s494_s22 }
  0x97   :  { %s709_s25 = scalar_lea.hbm %s132_s24, 16  ;;  %p712_p1 = scmp.lt.s32.totalorder %s132_s24, %s1244_s1 }
  0x98   :  { %p710_p0 = scmp.ne.s32.totalorder %s132_s24, %s709_s25  ;;  %p713_p2 = scmp.lt.s32.totalorder %s1020_s29, %s709_s25 }
  0x9a   :  { %p714_p3 = por %p713_p2, %p712_p1 }
  0x9c   :  { %p715_p4 = pnand %p714_p3, %p710_p0 }
  0x9e   :  { %718 = shalt.err (!%p715_p4)  }
  0x9f   :  { %s719_s20 = scalar_lea.vmem %s143_s15, 16  ;;  %p724_p6 = scmp.lt.s32.totalorder %s143_s15, %s1003_s14 }
  0xa0   :  { %p720_p5 = scmp.ne.s32.totalorder %s143_s15, %s719_s20  ;;  %p725_p7 = scmp.lt.s32.totalorder %s1029_s5, %s719_s20 }
  0xa2   :  { %p726_p8 = por %p725_p7, %p724_p6 }
  0xa4   :  { %p727_p9 = pnand %p726_p8, %p720_p5 }
  0xa6   :  { %730 = shalt.err (!%p727_p9)  }
  0xa7   :  { %145 = dma.hbm_to_vmem [thread:$0]  %s132_s24, 16, %s143_s15, [#allocation3 + $0x7] }
  0xa8   :  { %s496_s28 = sshll.u32 %s495_s16, 4  ;;  %s973_s30 = smov [#allocation2 + $0x9]  }
  0xa9   :  { %s176_s3 = sshll.u32 %s973_s30, 4  ;;  %s149_s0 = scalar_lea.hbm %s1244_s1, %s496_s28  ;;  %s1130_s3 = int_to_ptr.vmem [resolvable:$true] %s176_s3 }
  0xaa   :  { %s731_s7 = scalar_lea.hbm %s149_s0, 16  ;;  %p734_p11 = scmp.lt.s32.totalorder %s149_s0, %s1244_s1 }
  0xab   :  { %p732_p10 = scmp.ne.s32.totalorder %s149_s0, %s731_s7  ;;  %p735_p12 = scmp.lt.s32.totalorder %s1020_s29, %s731_s7 }
  0xad   :  { %p736_p13 = por %p735_p12, %p734_p11 }
  0xaf   :  { %p737_p0 = pnand %p736_p13, %p732_p10 }
  0xb1   :  { %740 = shalt.err (!%p737_p0)  }
  0xb2   :  { %s741_s12 = scalar_lea.vmem %s1116_s19, 16  ;;  %p746_p2 = scmp.lt.s32.totalorder %s1116_s19, %s1003_s14 }
  0xb3   :  { %p742_p1 = scmp.ne.s32.totalorder %s1116_s19, %s741_s12  ;;  %p747_p3 = scmp.lt.s32.totalorder %s1029_s5, %s741_s12 }
  0xb5   :  { %p748_p4 = por %p747_p3, %p746_p2 }
  0xb7   :  { %p749_p5 = pnand %p748_p4, %p742_p1 }
  0xb9   :  { %752 = shalt.err (!%p749_p5)  }
  0xba   :  { %162 = dma.hbm_to_vmem [thread:$0]  %s149_s0, 16, %s1116_s19, [#allocation3 + $0x8] }
  0xbb   :  { %s498_s13 = sshll.u32 %s1114_s21, 4  ;;  %s499_s10 = sld [smem:[#allocation5 + $0xa]] }
  0xbc   :  { %s166_s16 = scalar_lea.hbm %s1244_s1, %s498_s13 }
  0xbd   :  { %s753_s18 = scalar_lea.hbm %s166_s16, 16  ;;  %p756_p7 = scmp.lt.s32.totalorder %s166_s16, %s1244_s1 }
  0xbe   :  { %p754_p6 = scmp.ne.s32.totalorder %s166_s16, %s753_s18  ;;  %p757_p8 = scmp.lt.s32.totalorder %s1020_s29, %s753_s18 }
  0xc0   :  { %p758_p9 = por %p757_p8, %p756_p7 }
  0xc2   :  { %p759_p10 = pnand %p758_p9, %p754_p6 }
  0xc4   :  { %762 = shalt.err (!%p759_p10)  }
  0xc5   :  { %s763_s19 = scalar_lea.vmem %s1130_s3, 16  ;;  %p768_p12 = scmp.lt.s32.totalorder %s1130_s3, %s1003_s14 }
  0xc6   :  { %p764_p11 = scmp.ne.s32.totalorder %s1130_s3, %s763_s19  ;;  %p769_p13 = scmp.lt.s32.totalorder %s1029_s5, %s763_s19 }
  0xc8   :  { %p770_p0 = por %p769_p13, %p768_p12 }
  0xca   :  { %p771_p1 = pnand %p770_p0, %p764_p11 }
  0xcc   :  { %774 = shalt.err (!%p771_p1)  }
  0xcd   :  { %179 = dma.hbm_to_vmem [thread:$0]  %s166_s16, 16, %s1130_s3, [#allocation3 + $0x9] }
  0xce   :  { %s974_s21 = smov [#allocation2 + $0xa]   ;;  %s501_s24 = sld [smem:[#allocation5 + $0xb]] }
  0xcf   :  { %s193_s17 = sshll.u32 %s974_s21, 4  ;;  %s975_s25 = smov [#allocation2 + $0xb]   ;;  %s194_s17 = int_to_ptr.vmem [resolvable:$true] %s193_s17 }
  0xd0   :  { %s210_s26 = sshll.u32 %s975_s25, 4  ;;  %s1156_s27 = sld [smem:[#allocation5 + $0xc]]  ;;  %s1158_s26 = int_to_ptr.vmem [resolvable:$true] %s210_s26 }
  0xd1   :  { %s500_s20 = sshll.u32 %s499_s10, 4 }
  0xd2   :  { %s183_s4 = scalar_lea.hbm %s1244_s1, %s500_s20 }
  0xd3   :  { %s775_s6 = scalar_lea.hbm %s183_s4, 16  ;;  %p778_p3 = scmp.lt.s32.totalorder %s183_s4, %s1244_s1 }
  0xd4   :  { %p776_p2 = scmp.ne.s32.totalorder %s183_s4, %s775_s6  ;;  %p779_p4 = scmp.lt.s32.totalorder %s1020_s29, %s775_s6 }
  0xd6   :  { %p780_p5 = por %p779_p4, %p778_p3 }
  0xd8   :  { %p781_p6 = pnand %p780_p5, %p776_p2 }
  0xda   :  { %784 = shalt.err (!%p781_p6)  }
  0xdb   :  { %s785_s3 = scalar_lea.vmem %s194_s17, 16  ;;  %p790_p8 = scmp.lt.s32.totalorder %s194_s17, %s1003_s14 }
  0xdc   :  { %p786_p7 = scmp.ne.s32.totalorder %s194_s17, %s785_s3  ;;  %p791_p9 = scmp.lt.s32.totalorder %s1029_s5, %s785_s3 }
  0xde   :  { %p792_p10 = por %p791_p9, %p790_p8 }
  0xe0   :  { %p793_p11 = pnand %p792_p10, %p786_p7 }
  0xe2   :  { %796 = shalt.err (!%p793_p11)  }
  0xe3   :  { %196 = dma.hbm_to_vmem [thread:$0]  %s183_s4, 16, %s194_s17, [#allocation3 + $0xa] }
  0xe4   :  { %s502_s8 = sshll.u32 %s501_s24, 4  ;;  %s976_s9 = smov [#allocation2 + $0xc]  }
  0xe5   :  { %s227_s12 = sshll.u32 %s976_s9, 4  ;;  %s200_s11 = scalar_lea.hbm %s1244_s1, %s502_s8  ;;  %s1172_s12 = int_to_ptr.vmem [resolvable:$true] %s227_s12 }
  0xe6   :  { %s797_s15 = scalar_lea.hbm %s200_s11, 16  ;;  %p800_p13 = scmp.lt.s32.totalorder %s200_s11, %s1244_s1 }
  0xe7   :  { %p798_p12 = scmp.ne.s32.totalorder %s200_s11, %s797_s15  ;;  %p801_p0 = scmp.lt.s32.totalorder %s1020_s29, %s797_s15 }
  0xe9   :  { %p802_p1 = por %p801_p0, %p800_p13 }
  0xeb   :  { %p803_p2 = pnand %p802_p1, %p798_p12 }
  0xed   :  { %806 = shalt.err (!%p803_p2)  }
  0xee   :  { %s807_s22 = scalar_lea.vmem %s1158_s26, 16  ;;  %p812_p4 = scmp.lt.s32.totalorder %s1158_s26, %s1003_s14 }
  0xef   :  { %p808_p3 = scmp.ne.s32.totalorder %s1158_s26, %s807_s22  ;;  %p813_p5 = scmp.lt.s32.totalorder %s1029_s5, %s807_s22 }
  0xf1   :  { %p814_p6 = por %p813_p5, %p812_p4 }
  0xf3   :  { %p815_p7 = pnand %p814_p6, %p808_p3 }
  0xf5   :  { %818 = shalt.err (!%p815_p7)  }
  0xf6   :  { %213 = dma.hbm_to_vmem [thread:$0]  %s200_s11, 16, %s1158_s26, [#allocation3 + $0xb] }
  0xf7   :  { %s504_s23 = sshll.u32 %s1156_s27, 4  ;;  %s505_s19 = sld [smem:[#allocation5 + $0xd]] }
  0xf8   :  { %s217_s24 = scalar_lea.hbm %s1244_s1, %s504_s23 }
  0xf9   :  { %s819_s25 = scalar_lea.hbm %s217_s24, 16  ;;  %p822_p9 = scmp.lt.s32.totalorder %s217_s24, %s1244_s1 }
  0xfa   :  { %p820_p8 = scmp.ne.s32.totalorder %s217_s24, %s819_s25  ;;  %p823_p10 = scmp.lt.s32.totalorder %s1020_s29, %s819_s25 }
  0xfc   :  { %p824_p11 = por %p823_p10, %p822_p9 }
  0xfe   :  { %p825_p12 = pnand %p824_p11, %p820_p8 }
 0x100   :  { %828 = shalt.err (!%p825_p12)  }
 0x101   :  { %s829_s26 = scalar_lea.vmem %s1172_s12, 16  ;;  %p834_p0 = scmp.lt.s32.totalorder %s1172_s12, %s1003_s14 }
 0x102   :  { %p830_p13 = scmp.ne.s32.totalorder %s1172_s12, %s829_s26  ;;  %p835_p1 = scmp.lt.s32.totalorder %s1029_s5, %s829_s26 }
 0x104   :  { %p836_p2 = por %p835_p1, %p834_p0 }
 0x106   :  { %p837_p3 = pnand %p836_p2, %p830_p13 }
 0x108   :  { %840 = shalt.err (!%p837_p3)  }
 0x109   :  { %230 = dma.hbm_to_vmem [thread:$0]  %s217_s24, 16, %s1172_s12, [#allocation3 + $0xc] }
 0x10a   :  { %s977_s27 = smov [#allocation2 + $0xd]   ;;  %s507_s4 = sld [smem:[#allocation5 + $0xe]] }
 0x10b   :  { %s244_s30 = sshll.u32 %s977_s27, 4  ;;  %s978_s6 = smov [#allocation2 + $0xe]   ;;  %s245_s30 = int_to_ptr.vmem [resolvable:$true] %s244_s30 }
 0x10c   :  { %s261_s0 = sshll.u32 %s978_s6, 4  ;;  %s1198_s7 = sld [smem:[#allocation5 + $0xf]]  ;;  %s1200_s0 = int_to_ptr.vmem [resolvable:$true] %s261_s0 }
 0x10d   :  { %s506_s3 = sshll.u32 %s505_s19, 4 }
 0x10e   :  { %s234_s13 = scalar_lea.hbm %s1244_s1, %s506_s3 }
 0x10f   :  { %s841_s10 = scalar_lea.hbm %s234_s13, 16  ;;  %p844_p5 = scmp.lt.s32.totalorder %s234_s13, %s1244_s1 }
 0x110   :  { %p842_p4 = scmp.ne.s32.totalorder %s234_s13, %s841_s10  ;;  %p845_p6 = scmp.lt.s32.totalorder %s1020_s29, %s841_s10 }
 0x112   :  { %p846_p7 = por %p845_p6, %p844_p5 }
 0x114   :  { %p847_p8 = pnand %p846_p7, %p842_p4 }
 0x116   :  { %850 = shalt.err (!%p847_p8)  }
 0x117   :  { %s851_s12 = scalar_lea.vmem %s245_s30, 16  ;;  %p856_p10 = scmp.lt.s32.totalorder %s245_s30, %s1003_s14 }
 0x118   :  { %p852_p9 = scmp.ne.s32.totalorder %s245_s30, %s851_s12  ;;  %p857_p11 = scmp.lt.s32.totalorder %s1029_s5, %s851_s12 }
 0x11a   :  { %p858_p12 = por %p857_p11, %p856_p10 }
 0x11c   :  { %p859_p13 = pnand %p858_p12, %p852_p9 }
 0x11e   :  { %862 = shalt.err (!%p859_p13)  }
 0x11f   :  { %247 = dma.hbm_to_vmem [thread:$0]  %s234_s13, 16, %s245_s30, [#allocation3 + $0xd] }
 0x120   :  { %s508_s16 = sshll.u32 %s507_s4, 4  ;;  %s979_s18 = smov [#allocation2 + $0xf]  }
 0x121   :  { %s278_s22 = sshll.u32 %s979_s18, 4  ;;  %s251_s21 = scalar_lea.hbm %s1244_s1, %s508_s16  ;;  %s1214_s22 = int_to_ptr.vmem [resolvable:$true] %s278_s22 }
 0x122   :  { %s863_s17 = scalar_lea.hbm %s251_s21, 16  ;;  %p866_p1 = scmp.lt.s32.totalorder %s251_s21, %s1244_s1 }
 0x123   :  { %p864_p0 = scmp.ne.s32.totalorder %s251_s21, %s863_s17  ;;  %p867_p2 = scmp.lt.s32.totalorder %s1020_s29, %s863_s17 }
 0x125   :  { %p868_p3 = por %p867_p2, %p866_p1 }
 0x127   :  { %p869_p4 = pnand %p868_p3, %p864_p0 }
 0x129   :  { %872 = shalt.err (!%p869_p4)  }
 0x12a   :  { %s873_s20 = scalar_lea.vmem %s1200_s0, 16  ;;  %p878_p6 = scmp.lt.s32.totalorder %s1200_s0, %s1003_s14 }
 0x12b   :  { %p874_p5 = scmp.ne.s32.totalorder %s1200_s0, %s873_s20  ;;  %p879_p7 = scmp.lt.s32.totalorder %s1029_s5, %s873_s20 }
 0x12d   :  { %p880_p8 = por %p879_p7, %p878_p6 }
 0x12f   :  { %p881_p9 = pnand %p880_p8, %p874_p5 }
 0x131   :  { %884 = shalt.err (!%p881_p9)  }
 0x132   :  { %264 = dma.hbm_to_vmem [thread:$0]  %s251_s21, 16, %s1200_s0, [#allocation3 + $0xe] }
 0x133   :  { %s510_s28 = sshll.u32 %s1198_s7, 4 }
 0x134   :  { %s268_s30 = scalar_lea.hbm %s1244_s1, %s510_s28 }
 0x135   :  { %s885_s4 = scalar_lea.hbm %s268_s30, 16  ;;  %p888_p11 = scmp.lt.s32.totalorder %s268_s30, %s1244_s1 }
 0x136   :  { %p886_p10 = scmp.ne.s32.totalorder %s268_s30, %s885_s4  ;;  %p889_p12 = scmp.lt.s32.totalorder %s1020_s29, %s885_s4 }
 0x138   :  { %p890_p13 = por %p889_p12, %p888_p11 }
 0x13a   :  { %p891_p0 = pnand %p890_p13, %p886_p10 }
 0x13c   :  { %894 = shalt.err (!%p891_p0)  }
 0x13d   :  { %s895_s0 = scalar_lea.vmem %s1214_s22, 16  ;;  %p900_p2 = scmp.lt.s32.totalorder %s1214_s22, %s1003_s14 }
 0x13e   :  { %p896_p1 = scmp.ne.s32.totalorder %s1214_s22, %s895_s0  ;;  %p901_p3 = scmp.lt.s32.totalorder %s1029_s5, %s895_s0 }
 0x140   :  { %p902_p4 = por %p901_p3, %p900_p2 }
 0x142   :  { %p903_p5 = pnand %p902_p4, %p896_p1 }
 0x144   :  { %906 = shalt.err (!%p903_p5)  }
 0x145   :  { %281 = dma.hbm_to_vmem [thread:$0]  %s268_s30, 16, %s1214_s22, [#allocation3 + $0xf] }
 0x146   :  { %929 = dma.done.wait [#allocation3], 16 }
 0x147   :  { %930 = vsyncadd [#allocation3], 4294967280 }
 0x148   :  { %931 = dma.done.wait [#allocation3 + $0x1], 16 }
 0x149   :  { %932 = vsyncadd [#allocation3 + $0x1], 4294967280 }
 0x14a   :  { %933 = dma.done.wait [#allocation3 + $0x2], 16 }
 0x14b   :  { %934 = vsyncadd [#allocation3 + $0x2], 4294967280 }
 0x14c   :  { %935 = dma.done.wait [#allocation3 + $0x3], 16 }
 0x14d   :  { %936 = vsyncadd [#allocation3 + $0x3], 4294967280 }
 0x14e   :  { %937 = dma.done.wait [#allocation3 + $0x4], 16 }
 0x14f   :  { %938 = vsyncadd [#allocation3 + $0x4], 4294967280 }
 0x150   :  { %939 = dma.done.wait [#allocation3 + $0x5], 16 }
 0x151   :  { %940 = vsyncadd [#allocation3 + $0x5], 4294967280 }
 0x152   :  { %941 = dma.done.wait [#allocation3 + $0x6], 16 }
 0x153   :  { %942 = vsyncadd [#allocation3 + $0x6], 4294967280 }
 0x154   :  { %943 = dma.done.wait [#allocation3 + $0x7], 16 }
 0x155   :  { %944 = vsyncadd [#allocation3 + $0x7], 4294967280 }
 0x156   :  { %945 = dma.done.wait [#allocation3 + $0x8], 16 }
 0x157   :  { %946 = vsyncadd [#allocation3 + $0x8], 4294967280 }
 0x158   :  { %947 = dma.done.wait [#allocation3 + $0x9], 16 }
 0x159   :  { %948 = vsyncadd [#allocation3 + $0x9], 4294967280 }
 0x15a   :  { %949 = dma.done.wait [#allocation3 + $0xa], 16 }
 0x15b   :  { %950 = vsyncadd [#allocation3 + $0xa], 4294967280 }
 0x15c   :  { %951 = dma.done.wait [#allocation3 + $0xb], 16 }
 0x15d   :  { %952 = vsyncadd [#allocation3 + $0xb], 4294967280 }
 0x15e   :  { %953 = dma.done.wait [#allocation3 + $0xc], 16 }
 0x15f   :  { %954 = vsyncadd [#allocation3 + $0xc], 4294967280 }
 0x160   :  { %955 = dma.done.wait [#allocation3 + $0xd], 16 }
 0x161   :  { %956 = vsyncadd [#allocation3 + $0xd], 4294967280 }
 0x162   :  { %957 = dma.done.wait [#allocation3 + $0xe], 16 }
 0x163   :  { %958 = vsyncadd [#allocation3 + $0xe], 4294967280 }
 0x164   :  { %959 = dma.done.wait [#allocation3 + $0xf], 16 }
 0x165   :  { %960 = vsyncadd [#allocation3 + $0xf], 4294967280  ;;  %s980_s1 = smov [#allocation6]   ;;  %v315_v0 = vld [vmem:[#allocation2] sm:$0xff]  ;;  %v316_v1 = vld [vmem:[#allocation2 + $0x8] sm:$0xff] }
 0x166   :  { %s326_s14 = sshll.u32 %s980_s1, 4  ;;  %v317_v2 = vmul.f32 11.313708, %v315_v0  ;;  %v318_v3 = vmul.f32 11.313708, %v316_v1  ;;  %s327_s14 = int_to_ptr.vmem [resolvable:$true] %s326_s14 }
 0x167   :  { %s907_s29 = scalar_lea.vmem %s327_s14, 256  ;;  %p912_p7 = scmp.lt.s32.totalorder %s327_s14, %s327_s14 }
 0x168   :  { %319 = vst [vmem:[#allocation6] sm:$0xff] %v317_v2  ;;  %320 = vst [vmem:[#allocation6 + $0x8] sm:$0xff] %v318_v3  ;;  %p908_p6 = scmp.ne.s32.totalorder %s327_s14, %s907_s29  ;;  %p913_p8 = scmp.lt.s32.totalorder %s907_s29, %s907_s29 }
 0x16a   :  { %p914_p9 = por %p913_p8, %p912_p7 }
 0x16c   :  { %p915_p10 = pnand %p914_p9, %p908_p6 }
 0x16e   :  { %918 = shalt.err (!%p915_p10)
}
 0x16f   :  { %s981_s5 = smov 128   ;;  %s982_s7 = smov 8  }
 0x170   :  { %332 = dma.vmem_to_hbm [thread:$0]  %s327_s14, 256, %s1245_s2, [#allocation7], %s981_s5, %s981_s5, %s982_s7  }
 0x171   :  { %961 = dma.done.wait [#allocation7], 256  }
 0x172   :  { %962 = vsyncadd [#allocation7], 4294967040 }
 0x173   :  { %336 = vsyncpa [#allocation7], 1 }
 0x174   :  { %337 = vsyncmov [#allocation3] }
 0x177   :  { %s338_s13 = vpop.sfrf %337 }
 0x178   :  { %p511_p11 = scmp.ne.s32.totalorder %s338_s13, 0 }
 0x17a   :  { %342 = shalt.err (%p511_p11)  }
 0x17b   :  { %344 = vsyncmov [#allocation3 + $0x1] }
 0x17e   :  { %s345_s10 = vpop.sfrf %344 }
 0x17f   :  { %p512_p12 = scmp.ne.s32.totalorder %s345_s10, 0 }
 0x181   :  { %349 = shalt.err (%p512_p12)  }
 0x182   :  { %351 = vsyncmov [#allocation3 + $0x2] }
 0x185   :  { %s352_s11 = vpop.sfrf %351 }
 0x186   :  { %p513_p13 = scmp.ne.s32.totalorder %s352_s11, 0 }
 0x188   :  { %356 = shalt.err (%p513_p13)  }
 0x189   :  { %358 = vsyncmov [#allocation3 + $0x3] }
 0x18c   :  { %s359_s15 = vpop.sfrf %358 }
 0x18d   :  { %p514_p0 = scmp.ne.s32.totalorder %s359_s15, 0 }
 0x18f   :  { %363 = shalt.err (%p514_p0)  }
 0x190   :  { %365 = vsyncmov [#allocation3 + $0x4] }
 0x193   :  { %s366_s2 = vpop.sfrf %365 }
 0x194   :  { %p515_p1 = scmp.ne.s32.totalorder %s366_s2, 0 }
 0x196   :  { %370 = shalt.err (%p515_p1)  }
 0x197   :  { %372 = vsyncmov [#allocation3 + $0x5] }
 0x19a   :  { %s373_s12 = vpop.sfrf %372 }
 0x19b   :  { %p516_p2 = scmp.ne.s32.totalorder %s373_s12, 0 }
 0x19d   :  { %377 = shalt.err (%p516_p2)  }
 0x19e   :  { %379 = vsyncmov [#allocation3 + $0x6] }
 0x1a1   :  { %s380_s16 = vpop.sfrf %379 }
 0x1a2   :  { %p517_p3 = scmp.ne.s32.totalorder %s380_s16, 0 }
 0x1a4   :  { %384 = shalt.err (%p517_p3)  }
 0x1a5   :  { %386 = vsyncmov [#allocation3 + $0x7] }
 0x1a8   :  { %s387_s18 = vpop.sfrf %386 }
 0x1a9   :  { %p518_p4 = scmp.ne.s32.totalorder %s387_s18, 0 }
 0x1ab   :  { %391 = shalt.err (%p518_p4)  }
 0x1ac   :  { %393 = vsyncmov [#allocation3 + $0x8] }
 0x1af   :  { %s394_s22 = vpop.sfrf %393 }
 0x1b0   :  { %p519_p5 = scmp.ne.s32.totalorder %s394_s22, 0 }
 0x1b2   :  { %398 = shalt.err (%p519_p5)  }
 0x1b3   :  { %400 = vsyncmov [#allocation3 + $0x9] }
 0x1b6   :  { %s401_s23 = vpop.sfrf %400 }
 0x1b7   :  { %p520_p6 = scmp.ne.s32.totalorder %s401_s23, 0 }
 0x1b9   :  { %405 = shalt.err (%p520_p6)  }
 0x1ba   :  { %407 = vsyncmov [#allocation3 + $0xa] }
 0x1bd   :  { %s408_s19 = vpop.sfrf %407 }
 0x1be   :  { %p521_p7 = scmp.ne.s32.totalorder %s408_s19, 0 }
 0x1c0   :  { %412 = shalt.err (%p521_p7)  }
 0x1c1   :  { %414 = vsyncmov [#allocation3 + $0xb] }
 0x1c4   :  { %s415_s21 = vpop.sfrf %414 }
 0x1c5   :  { %p522_p8 = scmp.ne.s32.totalorder %s415_s21, 0 }
 0x1c7   :  { %419 = shalt.err (%p522_p8)  }
 0x1c8   :  { %421 = vsyncmov [#allocation3 + $0xc] }
 0x1cb   :  { %s422_s17 = vpop.sfrf %421 }
 0x1cc   :  { %p523_p9 = scmp.ne.s32.totalorder %s422_s17, 0 }
 0x1ce   :  { %426 = shalt.err (%p523_p9)  }
 0x1cf   :  { %428 = vsyncmov [#allocation3 + $0xd] }
 0x1d2   :  { %s429_s24 = vpop.sfrf %428 }
 0x1d3   :  { %p524_p10 = scmp.ne.s32.totalorder %s429_s24, 0 }
 0x1d5   :  { %433 = shalt.err (%p524_p10)  }
 0x1d6   :  { %435 = vsyncmov [#allocation3 + $0xe] }
 0x1d9   :  { %s436_s25 = vpop.sfrf %435 }
 0x1da   :  { %p525_p11 = scmp.ne.s32.totalorder %s436_s25, 0 }
 0x1dc   :  { %440 = shalt.err (%p525_p11)  }
 0x1dd   :  { %442 = vsyncmov [#allocation3 + $0xf] }
 0x1e0   :  { %s443_s20 = vpop.sfrf %442 }
 0x1e1   :  { %p526_p12 = scmp.ne.s32.totalorder %s443_s20, 0 }
 0x1e3   :  { %447 = shalt.err (%p526_p12)  }

</bundles_post_ra>
